<compile_context>
chip_gen: v7x
topology: tpu7x:2x2x1
jax: 0.10.0
libtpu: 0.0.40
codegen_flags: <defaults>
</compile_context>

<pallas_src>
import jax
import jax.numpy as jnp
from jax.experimental import pallas as pl
from jax.experimental.pallas import tpu as pltpu

OUT_PAD = 128  # lane-dense output width


def linear_kernel(x_ref, w_ref, b_ref, o_ref):
    # x_ref: (TM, IN)  w_ref: (IN, OUT_PAD)  b_ref: (1, OUT_PAD)  o_ref: (TM, OUT_PAD)
    acc = jnp.dot(x_ref[...], w_ref[...], preferred_element_type=jnp.float32)
    o_ref[...] = (acc + b_ref[...]).astype(o_ref.dtype)


def simple_cnn_forward(x, w, b, *, tm=1024):
    """x: (B, 42) float32, w: (42, 10) float32, b: (10,) float32 -> (B, 10)."""
    B, IN = x.shape
    OUT = w.shape[1]

    # Batch tile: large for big batches, shrinks for tiny ones; multiple of 8.
    tm_eff = min(tm, max(8, pl.next_power_of_2(B)))
    n_tiles = pl.cdiv(B, tm_eff)
    B_pad = n_tiles * tm_eff

    # Pad batch rows to a multiple of the tile (zero rows, sliced off afterwards).
    x_p = jnp.pad(x, ((0, B_pad - B), (0, 0)))
    # Zero-pad weight / bias columns to 128 so the output slab is lane-dense.
    w_p = jnp.zeros((IN, OUT_PAD), x.dtype).at[:, :OUT].set(w)
    b_p = jnp.zeros((1, OUT_PAD), x.dtype).at[0, :OUT].set(b)

    out_padded = pl.pallas_call(
        linear_kernel,
        out_shape=jax.ShapeDtypeStruct((B_pad, OUT_PAD), x.dtype),
        grid_spec=pl.GridSpec(
            grid=(n_tiles,),
            in_specs=[
                pl.BlockSpec((tm_eff, IN), lambda i: (i, 0)),    # streamed per batch tile
                pl.BlockSpec((IN, OUT_PAD), lambda i: (0, 0)),   # resident weight
                pl.BlockSpec((1, OUT_PAD), lambda i: (0, 0)),    # resident bias
            ],
            out_specs=pl.BlockSpec((tm_eff, OUT_PAD), lambda i: (i, 0)),
        ),
        compiler_params=pltpu.CompilerParams(
            dimension_semantics=("parallel",),  # shard batch tiles across TCs (v7x)
        ),
    )(x_p, w_p, b_p)

    return out_padded[:B, :OUT]


def init_params(key):
    """Deterministic init matching nn.Linear(42, 10) parameter shapes.

    PyTorch stores weight as (out_features, in_features) = (10, 42); generate in
    that convention and transpose for the kernel's (IN, OUT) matmul.
    """
    k_w, k_b = jax.random.split(key)
    bound = 1.0 / jnp.sqrt(42.0)  # PyTorch Linear default uniform bound
    w_torch = jax.random.uniform(k_w, (10, 42), jnp.float32, -bound, bound)
    b = jax.random.uniform(k_b, (10,), jnp.float32, -bound, bound)
    return w_torch.T, b  # (42, 10), (10,)


if __name__ == "__main__":
    key = jax.random.PRNGKey(0)
    k_x, k_p = jax.random.split(key)

    batch = 8
    x = jax.random.normal(k_x, (batch, 42), jnp.float32)
    w, b = init_params(k_p)

    out = simple_cnn_forward(x, w, b)
    jax.block_until_ready(out)

    # Sanity check against plain JAX reference.
    ref = x @ w + b
    assert out.shape == (batch, 10)
    assert jnp.allclose(out, ref, atol=1e-5, rtol=1e-5)

    print("KERNEL_OK")
</pallas_src>

<mosaic_0001>
module attributes {stable_mosaic.version = 11 : i64} {
  func.func @linear_kernel(%arg0: i32, %arg1: memref<8x42xf32, #tpu.memory_space<vmem>>, %arg2: memref<42x128xf32, #tpu.memory_space<vmem>>, %arg3: memref<1x128xf32, #tpu.memory_space<vmem>>, %arg4: memref<8x128xf32, #tpu.memory_space<vmem>>) attributes {dimension_semantics = [#tpu.dimension_semantics<parallel>], iteration_bounds = array<i64: 1>, scalar_prefetch = 0 : i64, scratch_operands = 0 : i64, tpu.core_type = #tpu.core_type<tc>, window_params = [{transform_indices = @transform_0, window_bounds = array<i64: 8, 42>}, {pipeline_mode = #tpu.pipeline_mode<synchronous>, transform_indices = @transform_1, window_bounds = array<i64: 42, 128>}, {pipeline_mode = #tpu.pipeline_mode<synchronous>, transform_indices = @transform_2, window_bounds = array<i64: 1, 128>}, {transform_indices = @transform_3, window_bounds = array<i64: 8, 128>}]} {
    %c0 = arith.constant 0 : index
    %c0_0 = arith.constant 0 : index
    %0 = vector.load %arg1[%c0, %c0_0] : memref<8x42xf32, #tpu.memory_space<vmem>>, vector<8x42xf32>
    %c0_1 = arith.constant 0 : index
    %c0_2 = arith.constant 0 : index
    %1 = vector.load %arg2[%c0_1, %c0_2] : memref<42x128xf32, #tpu.memory_space<vmem>>, vector<42x128xf32>
    %cst = arith.constant dense<0.000000e+00> : vector<8x128xf32>
    %2 = tpu.matmul %0, %1, %cst {dimension_numbers = #tpu.dot_dimension_numbers<[1], [0], [0], [1], [0, 0, 1, 1], [], []>} : vector<8x42xf32>, vector<42x128xf32>, vector<8x128xf32> -> vector<8x128xf32>
    %c0_3 = arith.constant 0 : index
    %c0_4 = arith.constant 0 : index
    %3 = vector.load %arg3[%c0_3, %c0_4] : memref<1x128xf32, #tpu.memory_space<vmem>>, vector<1x128xf32>
    %4 = vector.broadcast %3 : vector<1x128xf32> to vector<8x128xf32>
    %5 = arith.addf %2, %4 : vector<8x128xf32>
    %c0_5 = arith.constant 0 : index
    %c0_6 = arith.constant 0 : index
    %6 = vector.load %arg4[%c0_5, %c0_6] : memref<8x128xf32, #tpu.memory_space<vmem>>, vector<8x128xf32>
    tpu.vector_store %arg4[%c0_5, %c0_6], %5 {strides = array<i32>} : memref<8x128xf32, #tpu.memory_space<vmem>>, vector<8x128xf32>,
    return
  }
  func.func @transform_0(%arg0: i32) -> (i32, i32) {
    %c0_i32 = arith.constant 0 : i32
    %c0_i32_0 = arith.constant 0 : i32
    return %arg0, %c0_i32 : i32, i32
  }
  func.func @transform_1(%arg0: i32) -> (i32, i32) {
    %c0_i32 = arith.constant 0 : i32
    %c0_i32_0 = arith.constant 0 : i32
    %c0_i32_1 = arith.constant 0 : i32
    return %c0_i32, %c0_i32_0 : i32, i32
  }
  func.func @transform_2(%arg0: i32) -> (i32, i32) {
    %c0_i32 = arith.constant 0 : i32
    %c0_i32_0 = arith.constant 0 : i32
    %c0_i32_1 = arith.constant 0 : i32
    return %c0_i32, %c0_i32_0 : i32, i32
  }
  func.func @transform_3(%arg0: i32) -> (i32, i32) {
    %c0_i32 = arith.constant 0 : i32
    %c0_i32_0 = arith.constant 0 : i32
    return %arg0, %c0_i32 : i32, i32
  }
}

</mosaic_0001>

<bundles_post_ra>
// kernel: tpu_custom_call.1
= control target key start
LH: loop header
LB: loop body
LE: loop exit
PB: predicated region body
PF: predicated region fallthrough
CT: control target
= control target key end

     0   :  { %8 = vsyncpa [#allocation3], 0  ;;  %s341_s0 = inlined_call_operand.hbm [shape: f32[8,42], index: 0, kind: input, shape index: {}]   ;;  %s342_s1 = inlined_call_operand.hbm [shape: f32[42,128], index: 1, kind: input, shape index: {}]   ;;  %s343_s2 = inlined_call_operand.vmem [shape: f32[1,128], index: 2, kind: input, shape index: {}]   ;;  %s344_s3 = inlined_call_operand.hbm [shape: f32[8,128], index: 3, kind: output, shape index: {}]  }
   0x1   :  { %9 = vsyncpa [#allocation6], 0 }
   0x2   :  { %10 = vsyncpa [#allocation4], 0  ;;  %s266_s12 = smov [#allocation2]   ;;  %s267_s14 = smov [#allocation5]  }
   0x3   :  { %s17_s13 = sshll.u32 %s266_s12, 4  ;;  %s26_s15 = sshll.u32 %s267_s14, 4  ;;  %s18_s13 = int_to_ptr.vmem [resolvable:$true] %s17_s13  ;;  %s295_s15 = int_to_ptr.vmem [resolvable:$true] %s26_s15 }
   0x4   :  { %s194_s18 = scalar_lea.hbm %s341_s0, 128 }
   0x5   :  { %p195_p0 = scmp.ne.s32.totalorder %s341_s0, %s194_s18  ;;  %p198_p1 = scmp.lt.u32.totalorder %s194_s18, %s341_s0 }
   0x7   :  { %p200_p2 = pnand %p198_p1, %p195_p0 }
   0x9   :  { %203 = shalt.err (!%p200_p2)
}
   0xa   :  { %s204_s23 = scalar_lea.vmem %s18_s13, 128  ;;  %p209_p4 = scmp.lt.s32.totalorder %s18_s13, %s18_s13 }
   0xb   :  { %p205_p3 = scmp.ne.s32.totalorder %s18_s13, %s204_s23  ;;  %p210_p5 = scmp.lt.s32.totalorder %s204_s23, %s204_s23 }
   0xd   :  { %p211_p6 = por %p210_p5, %p209_p4 }
   0xf   :  { %p212_p7 = pnand %p211_p6, %p205_p3 }
  0x11   :  { %215 = shalt.err (!%p212_p7)
}
  0x12   :  { %20 = dma.hbm_to_vmem [thread:$0]  %s341_s0, 128, %s18_s13, [#allocation3]  }
  0x13   :  { %s216_s28 = scalar_lea.hbm %s342_s1, 768 }
  0x14   :  { %p217_p8 = scmp.ne.s32.totalorder %s342_s1, %s216_s28  ;;  %p220_p9 = scmp.lt.u32.totalorder %s216_s28, %s342_s1 }
  0x16   :  { %p222_p10 = pnand %p220_p9, %p217_p8 }
  0x18   :  { %225 = shalt.err (!%p222_p10)
}
  0x19   :  { %s226_s6 = scalar_lea.vmem %s295_s15, 768  ;;  %p231_p12 = scmp.lt.s32.totalorder %s295_s15, %s295_s15 }
  0x1a   :  { %p227_p11 = scmp.ne.s32.totalorder %s295_s15, %s226_s6  ;;  %p232_p13 = scmp.lt.s32.totalorder %s226_s6, %s226_s6 }
  0x1c   :  { %p233_p0 = por %p232_p13, %p231_p12 }
  0x1e   :  { %p234_p1 = pnand %p233_p0, %p227_p11 }
  0x20   :  { %237 = shalt.err (!%p234_p1)
}
  0x21   :  { %s268_s0 = smov 128   ;;  %s269_s7 = smov 8  }
  0x22   :  { %32 = dma.hbm_to_vmem [thread:$0]  %s342_s1, 768, %s295_s15, [#allocation6], %s268_s0, %s268_s0, %s269_s7  }
  0x23   :  { %260 = dma.done.wait [#allocation3], 128  }
  0x24   :  { %261 = vsyncadd [#allocation3], 4294967168 }
  0x25   :  { %262 = dma.done.wait [#allocation6], 768  }
  0x26   :  { %263 = vsyncadd [#allocation6], 4294966528  ;;  %v270_v0 = vmov 0.0|0.0   ;;  %vm271_vm0 = vmmov 0   ;;  %v272_v1 = vmov 0.0   ;;  %v42_v2 = vld [vmem:[#allocation5] sm:$0xff] }
  0x27   :  { %175 = vmatprep.subr.bf16.mxu0 %v270_v0  ;;  %172 = vmatprep.mubr.msk.f32.mxu0 %vm271_vm0, %v272_v1  ;;  %v43_v3 = vld [vmem:[#allocation5 + $0x8] sm:$0xff]  ;;  %v44_v4 = vld [vmem:[#allocation5 + $0x10] sm:$0xff]  ;;  %v45_v6 = vld [vmem:[#allocation5 + $0x18] sm:$0xff]  ;;  %vm59_vm1 = vcmask 1041408   ;;  %vm273_vm2 = vmmov 1   ;;  %vm55_vm4 = vcmask 343040  }
  0x28   :  { %v176_v5 = vpack.c.bf16 %v43_v3, %v42_v2  ;;  %v179_v7 = vpack.c.bf16 %v45_v6, %v44_v4  ;;  %v46_v8 = vld [vmem:[#allocation5 + $0x20] sm:$0xff]  ;;  %v47_v9 = vld [vmem:[#allocation5 + $0x28] sm:$0x3]  ;;  %vm183_vm3 = vmpackc.low %vm59_vm1, %vm273_vm2  ;;  %s274_s11 = smov [#allocation7]  }
  0x29   :  { %v182_v10 = vpack.c.bf16 %v47_v9, %v46_v8  ;;  %v41_v11 = vld [vmem:[#allocation2] sm:$0xff]  ;;  %s140_s12 = sshll.u32 %s274_s11, 4  ;;  %s141_s12 = int_to_ptr.vmem [resolvable:$true] %s140_s12 }
  0x2a   :  { %177 = vmatpush3.bf16.msra.mxu0 %v176_v5  ;;  %v150_v12 = vld [vmem:[%s343_s2] ss:$0 sm:$0xff]  ;;  %s238_s13 = scalar_lea.vmem %s141_s12, 128  ;;  %p243_p3 = scmp.lt.s32.totalorder %s141_s12, %s141_s12 }
  0x2b   :  { %178 = vmatprep.subr.bf16.mxu0 %v270_v0  ;;  %p239_p2 = scmp.ne.s32.totalorder %s141_s12, %s238_s13  ;;  %p244_p4 = scmp.lt.s32.totalorder %s238_s13, %s238_s13 }
  0x2d   :  { %p245_p5 = por %p244_p4, %p243_p3 }
  0x2e   :  { %180 = vmatpush3.bf16.msra.mxu0 %v179_v7 }
  0x2f   :  { %181 = vmatprep.subr.bf16.mxu0 %v270_v0  ;;  %p246_p6 = pnand %p245_p5, %p239_p2 }
  0x32   :  { %184 = vmatpush3.bf16.msk.msra.mxu0 %vm183_vm3, %v182_v10 }
  0x35   :  { %173 = vmatmul.mubr.msk.f32.vlgmr.msra.gmra.mrb[0].mxu0 %vm55_vm4, %v41_v11 }
 0x108   :  { %v129_v13 = vpop.f32.mrb[0].mxu0 }
 0x109   :  { %v130_v14 = vadd.f32 %v150_v12, %v129_v13  ;;  %v174_v15 = vpop.f32.mrb[1].mxu0 }
 0x10b   :  { %133 = vst [vmem:[#allocation7] sm:$0xff] %v130_v14 }
 0x10c   :  { %249 = shalt.err (!%p246_p6)
}
 0x10d   :  { %s250_s16 = scalar_lea.hbm %s344_s3, 128 }
 0x10e   :  { %p251_p7 = scmp.ne.s32.totalorder %s344_s3, %s250_s16  ;;  %p254_p8 = scmp.lt.u32.totalorder %s250_s16, %s344_s3 }
 0x110   :  { %p256_p9 = pnand %p254_p8, %p251_p7 }
 0x112   :  { %259 = shalt.err (!%p256_p9)
}
 0x113   :  { %143 = dma.vmem_to_hbm [thread:$0]  %s141_s12, 128, %s344_s3, [#allocation4]  }
 0x114   :  { %264 = dma.done.wait [#allocation4], 128  }
 0x115   :  { %265 = vsyncadd [#allocation4], 4294967168 }
 0x116   :  { %147 = vsyncpa [#allocation3], 1 }
 0x117   :  { %148 = vsyncpa [#allocation6], 1 }
 0x118   :  { %149 = vsyncpa [#allocation4], 1 }

</bundles_post_ra>
